<compile_context>
chip_gen: v7x
topology: tpu7x:2x2x1
jax: 0.10.0
libtpu: 0.0.40
codegen_flags: <defaults>
</compile_context>

<pallas_src>
import jax
import jax.numpy as jnp
from jax.experimental import pallas as pl
from jax.experimental.pallas import tpu as pltpu


_LANE = 128
_TILE_VMEM_BUDGET = 16 * 1024 * 1024   # bytes for double-buffered x/out tiles
_VMEM_LIMIT_BYTES = 24 * 1024 * 1024   # scoped-VMEM limit passed to Mosaic


def _round_up(x, m):
    return (x + m - 1) // m * m


# --------------------------------------------------------------------------
# Kernel
# --------------------------------------------------------------------------
def _outconv_kernel(x_ref, w1_ref, c1_ref, w2_ref, b2_ref, out_ref):
    """One (batch, pixel-tile) step.

    x_ref  : (1, Cin,  TP)   activations, pixels on lanes
    w1_ref : (Cin, Cin)      conv1 weight with BN scale folded in (matmul dtype)
    c1_ref : (Cin, 1)        conv1 bias + BN shift folded (f32)
    w2_ref : (Cout, Cin)     conv2 weight (matmul dtype)
    b2_ref : (Cout, 1)       conv2 bias (f32)
    out_ref: (1, Cout, TP)
    """
    mm_dtype = w1_ref.dtype
    x = x_ref[0]                                             # (Cin, TP)

    # conv1 (1x1) + folded BN + ReLU  ->  (Cin, TP), f32 accumulate/epilogue.
    h = jnp.dot(w1_ref[...], x.astype(mm_dtype),
                preferred_element_type=jnp.float32)
    h = jnp.maximum(h + c1_ref[...], 0.0)

    # conv2 (1x1)  ->  (Cout, TP)
    y = jnp.dot(w2_ref[...], h.astype(mm_dtype),
                preferred_element_type=jnp.float32)
    out_ref[0] = (y + b2_ref[...]).astype(out_ref.dtype)


# --------------------------------------------------------------------------
# Tiling plan
# --------------------------------------------------------------------------
def _plan_pixel_tiling(n_batch, num_pixels, cin, cout, itemsize):
    """Returns (tp, padded_pixels).

    tp is a multiple of 128, sized so the double-buffered x tile + out tile
    fit in the VMEM budget; the pixel axis is padded up to a multiple of tp.
    If the whole grid would be a single step, split the pixels in two so both
    v7x TensorCores get work.
    """
    p128 = _round_up(num_pixels, _LANE)
    per_lane_bytes = (cin + cout) * itemsize * 2   # in + out, double-buffered
    tp = (_TILE_VMEM_BUDGET // per_lane_bytes) // _LANE * _LANE
    tp = max(_LANE, min(p128, tp))
    if n_batch * pl.cdiv(p128, tp) < 2 and p128 >= 2 * _LANE:
        tp = _round_up(p128 // 2, _LANE)
    p_pad = _round_up(p128, tp)
    return tp, p_pad


# --------------------------------------------------------------------------
# Wrapper
# --------------------------------------------------------------------------
def outconv_forward(x_nchw, params, *, matmul_dtype=None):
    """x_nchw: (N, Cin, H, W) -> (N, Cout, H, W)."""
    N, Cin, H, W = x_nchw.shape
    Cout = params["w2"].shape[0]
    P = H * W

    if matmul_dtype is None:
        matmul_dtype = x_nchw.dtype

    itemsize = jnp.dtype(x_nchw.dtype).itemsize
    tp, P_pad = _plan_pixel_tiling(N, P, Cin, Cout, itemsize)

    # Free reshape: NCHW is contiguous over (H, W); pixels land on the lane
    # axis so DMA rows are contiguous.  Pad pixels to a multiple of tp so the
    # output stores stay unmasked and the grid divides exactly.
    x = x_nchw.reshape(N, Cin, P)
    if P_pad != P:
        x = jnp.pad(x, ((0, 0), (0, 0), (0, P_pad - P)))

    # Pre-cast the resident weights in the wrapper (no per-step in-kernel VPU
    # cast work); biases stay f32 for the f32 elementwise epilogue.
    w1 = params["w1"].astype(matmul_dtype)
    w2 = params["w2"].astype(matmul_dtype)
    c1 = params["c1"].astype(jnp.float32)
    b2 = params["b2"].astype(jnp.float32)

    out = pl.pallas_call(
        _outconv_kernel,
        out_shape=jax.ShapeDtypeStruct((N, Cout, P_pad), x_nchw.dtype),
        grid_spec=pltpu.PrefetchScalarGridSpec(
            num_scalar_prefetch=0,
            grid=(N, P_pad // tp),
            in_specs=[
                pl.BlockSpec((1, Cin, tp), lambda n, p: (n, 0, p)),
                pl.BlockSpec((Cin, Cin),   lambda n, p: (0, 0)),
                pl.BlockSpec((Cin, 1),     lambda n, p: (0, 0)),
                pl.BlockSpec((Cout, Cin),  lambda n, p: (0, 0)),
                pl.BlockSpec((Cout, 1),    lambda n, p: (0, 0)),
            ],
            out_specs=pl.BlockSpec((1, Cout, tp), lambda n, p: (n, 0, p)),
        ),
        compiler_params=pltpu.CompilerParams(
            dimension_semantics=("parallel", "parallel"),
            vmem_limit_bytes=_VMEM_LIMIT_BYTES),
    )(x, w1, c1, w2, b2)

    if P_pad != P:
        out = out[:, :, :P]
    return out.reshape(N, Cout, H, W)


# --------------------------------------------------------------------------
# Parameter construction (deterministic, synthetic) + pure-JAX reference.
# --------------------------------------------------------------------------
def make_params(key, in_channels, out_channels, eps=1e-5):
    ks = jax.random.split(key, 8)
    # PyTorch layouts: conv weight (Cout, Cin, 1, 1), bias (Cout,)
    conv1_w = 0.1 * jax.random.normal(ks[0], (in_channels, in_channels, 1, 1), jnp.float32)
    conv1_b = 0.1 * jax.random.normal(ks[1], (in_channels,), jnp.float32)
    conv2_w = 0.1 * jax.random.normal(ks[2], (out_channels, in_channels, 1, 1), jnp.float32)
    conv2_b = 0.1 * jax.random.normal(ks[3], (out_channels,), jnp.float32)
    gamma = jax.random.uniform(ks[4], (in_channels,), jnp.float32, 0.8, 1.2)
    beta = 0.1 * jax.random.normal(ks[5], (in_channels,), jnp.float32)
    mean = 0.1 * jax.random.normal(ks[6], (in_channels,), jnp.float32)
    var = jax.random.uniform(ks[7], (in_channels,), jnp.float32, 0.5, 1.5)

    # Fold inference-mode BN into conv1: BN(W1 x + b1) = (s*W1) x + (s*(b1-mean)+beta)
    s = gamma / jnp.sqrt(var + eps)
    w1_folded = s[:, None] * conv1_w[:, :, 0, 0]                 # (Cin, Cin)
    c1_folded = s * (conv1_b - mean) + beta                      # (Cin,)

    params = {
        "w1": w1_folded,
        "c1": c1_folded[:, None],                                # (Cin, 1)
        "w2": conv2_w[:, :, 0, 0],                               # (Cout, Cin)
        "b2": conv2_b[:, None],                                  # (Cout, 1)
    }
    torch_like = dict(conv1_w=conv1_w, conv1_b=conv1_b, conv2_w=conv2_w,
                      conv2_b=conv2_b, gamma=gamma, beta=beta, mean=mean,
                      var=var, eps=eps)
    return params, torch_like


def reference_forward(x_nchw, tw):
    """Pure-JAX NCHW reference matching the PyTorch forward (inference BN)."""
    w1 = tw["conv1_w"][:, :, 0, 0]                               # (Cin, Cin)
    h = jnp.einsum("oc,nchw->nohw", w1, x_nchw) + tw["conv1_b"][None, :, None, None]
    s = tw["gamma"] / jnp.sqrt(tw["var"] + tw["eps"])
    h = s[None, :, None, None] * (h - tw["mean"][None, :, None, None]) \
        + tw["beta"][None, :, None, None]
    h = jnp.maximum(h, 0.0)
    w2 = tw["conv2_w"][:, :, 0, 0]                               # (Cout, Cin)
    out = jnp.einsum("oc,nchw->nohw", w2, h) + tw["conv2_b"][None, :, None, None]
    return out


if __name__ == "__main__":
    N, Cin, Cout, H, W = 2, 4, 8, 16, 16
    key = jax.random.PRNGKey(0)
    kx, kp = jax.random.split(key)

    x = jax.random.normal(kx, (N, Cin, H, W), jnp.float32)       # PyTorch NCHW input
    params, torch_like = make_params(kp, Cin, Cout)

    # f32-operand path (tight check).
    out = jax.block_until_ready(outconv_forward(x, params))
    ref = jax.block_until_ready(reference_forward(x, torch_like))
    assert out.shape == (N, Cout, H, W)
    assert jnp.allclose(out, ref, rtol=1e-4, atol=1e-4), (
        f"max abs err {jnp.max(jnp.abs(out - ref))}")

    # bf16 matmul-operand path (MXU-native dtype), looser tolerance.
    out_bf16 = jax.block_until_ready(
        outconv_forward(x, params, matmul_dtype=jnp.bfloat16))
    assert jnp.allclose(out_bf16, ref, rtol=5e-2, atol=5e-2), (
        f"max abs err (bf16) {jnp.max(jnp.abs(out_bf16 - ref))}")

    print("KERNEL_OK")
</pallas_src>

<mosaic_0001>
module attributes {stable_mosaic.version = 11 : i64} {
  func.func @_outconv_kernel(%arg0: i32, %arg1: i32, %arg2: memref<1x4x256xf32, #tpu.memory_space<vmem>>, %arg3: memref<4x4xf32, #tpu.memory_space<vmem>>, %arg4: memref<4x1xf32, #tpu.memory_space<vmem>>, %arg5: memref<8x4xf32, #tpu.memory_space<vmem>>, %arg6: memref<8x1xf32, #tpu.memory_space<vmem>>, %arg7: memref<1x8x256xf32, #tpu.memory_space<vmem>>) attributes {dimension_semantics = [#tpu.dimension_semantics<parallel>, #tpu.dimension_semantics<parallel>], iteration_bounds = array<i64: 2, 1>, scalar_prefetch = 0 : i64, scratch_operands = 0 : i64, tpu.core_type = #tpu.core_type<tc>, window_params = [{transform_indices = @transform_0, window_bounds = array<i64: 1, 4, 256>}, {pipeline_mode = #tpu.pipeline_mode<synchronous>, transform_indices = @transform_1, window_bounds = array<i64: 4, 4>}, {pipeline_mode = #tpu.pipeline_mode<synchronous>, transform_indices = @transform_2, window_bounds = array<i64: 4, 1>}, {pipeline_mode = #tpu.pipeline_mode<synchronous>, transform_indices = @transform_3, window_bounds = array<i64: 8, 4>}, {pipeline_mode = #tpu.pipeline_mode<synchronous>, transform_indices = @transform_4, window_bounds = array<i64: 8, 1>}, {transform_indices = @transform_5, window_bounds = array<i64: 1, 8, 256>}]} {
    %c0 = arith.constant 0 : index
    %c0_0 = arith.constant 0 : index
    %c0_1 = arith.constant 0 : index
    %0 = vector.load %arg2[%c0, %c0_0, %c0_1] : memref<1x4x256xf32, #tpu.memory_space<vmem>>, vector<1x4x256xf32>
    %1 = vector.shape_cast %0 : vector<1x4x256xf32> to vector<4x256xf32>
    %c0_2 = arith.constant 0 : index
    %c0_3 = arith.constant 0 : index
    %2 = vector.load %arg3[%c0_2, %c0_3] : memref<4x4xf32, #tpu.memory_space<vmem>>, vector<4x4xf32>
    %cst = arith.constant dense<0.000000e+00> : vector<4x256xf32>
    %3 = tpu.matmul %2, %1, %cst {dimension_numbers = #tpu.dot_dimension_numbers<[1], [0], [0], [1], [0, 0, 1, 1], [], []>} : vector<4x4xf32>, vector<4x256xf32>, vector<4x256xf32> -> vector<4x256xf32>
    %c0_4 = arith.constant 0 : index
    %c0_5 = arith.constant 0 : index
    %4 = vector.load %arg4[%c0_4, %c0_5] : memref<4x1xf32, #tpu.memory_space<vmem>>, vector<4x1xf32>
    %5 = vector.broadcast %4 : vector<4x1xf32> to vector<4x256xf32>
    %6 = arith.addf %3, %5 : vector<4x256xf32>
    %cst_6 = arith.constant 0.000000e+00 : f32
    %7 = vector.broadcast %cst_6 : f32 to vector<4x256xf32>
    %8 = arith.maximumf %6, %7 : vector<4x256xf32>
    %c0_7 = arith.constant 0 : index
    %c0_8 = arith.constant 0 : index
    %9 = vector.load %arg5[%c0_7, %c0_8] : memref<8x4xf32, #tpu.memory_space<vmem>>, vector<8x4xf32>
    %cst_9 = arith.constant dense<0.000000e+00> : vector<8x256xf32>
    %10 = tpu.matmul %9, %8, %cst_9 {dimension_numbers = #tpu.dot_dimension_numbers<[1], [0], [0], [1], [0, 0, 1, 1], [], []>} : vector<8x4xf32>, vector<4x256xf32>, vector<8x256xf32> -> vector<8x256xf32>
    %c0_10 = arith.constant 0 : index
    %c0_11 = arith.constant 0 : index
    %11 = vector.load %arg6[%c0_10, %c0_11] : memref<8x1xf32, #tpu.memory_space<vmem>>, vector<8x1xf32>
    %12 = vector.broadcast %11 : vector<8x1xf32> to vector<8x256xf32>
    %13 = arith.addf %10, %12 : vector<8x256xf32>
    %c0_12 = arith.constant 0 : index
    %c0_13 = arith.constant 0 : index
    %c0_14 = arith.constant 0 : index
    %14 = vector.load %arg7[%c0_12, %c0_13, %c0_14] : memref<1x8x256xf32, #tpu.memory_space<vmem>>, vector<1x8x256xf32>
    %15 = vector.shape_cast %14 : vector<1x8x256xf32> to vector<8x256xf32>
    %16 = vector.shape_cast %13 : vector<8x256xf32> to vector<1x8x256xf32>
    tpu.vector_store %arg7[%c0_12, %c0_13, %c0_14], %16 {strides = array<i32>} : memref<1x8x256xf32, #tpu.memory_space<vmem>>, vector<1x8x256xf32>,
    return
  }
  func.func @transform_0(%arg0: i32, %arg1: i32) -> (i32, i32, i32) {
    %c0_i32 = arith.constant 0 : i32
    %c0_i32_0 = arith.constant 0 : i32
    return %arg0, %c0_i32, %arg1 : i32, i32, i32
  }
  func.func @transform_1(%arg0: i32, %arg1: i32) -> (i32, i32) {
    %c0_i32 = arith.constant 0 : i32
    %c0_i32_0 = arith.constant 0 : i32
    %c0_i32_1 = arith.constant 0 : i32
    return %c0_i32, %c0_i32_0 : i32, i32
  }
  func.func @transform_2(%arg0: i32, %arg1: i32) -> (i32, i32) {
    %c0_i32 = arith.constant 0 : i32
    %c0_i32_0 = arith.constant 0 : i32
    %c0_i32_1 = arith.constant 0 : i32
    return %c0_i32, %c0_i32_0 : i32, i32
  }
  func.func @transform_3(%arg0: i32, %arg1: i32) -> (i32, i32) {
    %c0_i32 = arith.constant 0 : i32
    %c0_i32_0 = arith.constant 0 : i32
    %c0_i32_1 = arith.constant 0 : i32
    return %c0_i32, %c0_i32_0 : i32, i32
  }
  func.func @transform_4(%arg0: i32, %arg1: i32) -> (i32, i32) {
    %c0_i32 = arith.constant 0 : i32
    %c0_i32_0 = arith.constant 0 : i32
    %c0_i32_1 = arith.constant 0 : i32
    return %c0_i32, %c0_i32_0 : i32, i32
  }
  func.func @transform_5(%arg0: i32, %arg1: i32) -> (i32, i32, i32) {
    %c0_i32 = arith.constant 0 : i32
    %c0_i32_0 = arith.constant 0 : i32
    return %arg0, %c0_i32, %arg1 : i32, i32, i32
  }
}

</mosaic_0001>

<bundles_post_ra>
// kernel: tpu_custom_call.1
= control target key start
LH: loop header
LB: loop body
LE: loop exit
PB: predicated region body
PF: predicated region fallthrough
CT: control target
= control target key end

     0   :  { %10 = vsyncpa [#allocation3], 0  ;;  %s849_s0 = inlined_call_operand.vmem [shape: f32[2,4,256], index: 0, kind: input, shape index: {}]   ;;  %s850_s1 = inlined_call_operand.vmem [shape: f32[4,4], index: 1, kind: input, shape index: {}]   ;;  %s851_s2 = inlined_call_operand.vmem [shape: f32[4,1], index: 2, kind: input, shape index: {}]   ;;  %s852_s3 = inlined_call_operand.vmem [shape: f32[8,4], index: 3, kind: input, shape index: {}]   ;;  %s853_s4 = inlined_call_operand.vmem [shape: f32[8,1], index: 4, kind: input, shape index: {}]   ;;  %s854_s5 = inlined_call_operand.hbm [shape: f32[2,8,256], index: 5, kind: output, shape index: {}]  }
   0x1   :  { %12 = vsyncpa [#allocation3 + $0x1], 0  ;;  %s721_s18 = smov 0   ;;  %s723_s19 = smov 0  }
   0x2   :  { %s725_s20 = smov 0   ;;  %s727_s21 = smov 0  }
   0x3   :  { %s729_s22 = smov 0   ;;  %s731_s23 = smov 0  }
   0x4 LB: > { %s528_s24 = sadd.s32 4294967295, %s686_s23   ;;  %s529_s25 = sadd.s32 4294967294, %s686_s23   ;;  %s686_s23 = sphi %s731_s23, %s18_s23   ;;  %s682_s22 = sphi %s729_s22, %s861_s22   ;;  %s678_s21 = sphi %s727_s21, %s860_s21   ;;  %s674_s20 = sphi %s725_s20, %s859_s20   ;;  %s670_s19 = sphi %s723_s19, %s858_s19   ;;  %s666_s18 = sphi %s721_s18, %s857_s18  }
   0x5   : > { %s30_s26 = sadd.s32 1, %s682_s22  ;;  %s151_s27 = sadd.s32 1, %s674_s20 }
   0x6   : > { %p32_p0 = scmp.ge.s32.totalorder %s30_s26, 2  ;;  %p161_p1 = scmp.ne.s32.totalorder %s674_s20, %s670_s19 }
   0x7   : > { %p162_p2 = scmp.eq.s32.totalorder %s528_s24, 1  ;;  %p167_p3 = scmp.ne.s32.totalorder %s670_s19, %s666_s18 }
   0x8   : > { %s863_s26 = smov (%p32_p0, %s30_s26), 0  ;;  %p168_p5 = scmp.eq.s32.totalorder %s529_s25, 1 }
   0x9   : > { %p761_p4 = por %p162_p2, %p161_p1  ;;  %s146_s29 = ssub.s32 %s682_s22, %s863_s26 }
   0xa   : > { %p532_p6 = scmp.ge.s32.totalorder %s686_s23, 1  ;;  %p149_p7 = scmp.eq.s32.totalorder %s146_s29, 0 }
   0xb   : > { %p768_p8 = por %p168_p5, %p167_p3  ;;  %p211_p9 = scmp.lt.s32.totalorder %s686_s23, 3 }
   0xc   : > { %s774_s6 = scalar_select %p149_p7, %s674_s20, %s151_s27  }
   0xd   : > { %p212_p10 = pnand %p532_p6, %p211_p9 }
   0xe   : > { %p244_p11 = scmp.lt.s32.totalorder (!%p212_p10), %s678_s21, 1  ;;  %v688_v0 = vmov (!%p212_p10), 0.0   ;;  %v256_v1 = vld [vmem:[%s851_s2] sm:$0xf] (!%p212_p10)  ;;  %v689_v2 = vmov (!%p212_p10), 0   ;;  %vm268_vm0 = vcmask (!%p212_p10), 1043456  }
   0xf   : > { %215 = sbr.rel (%p212_p10) target bundleno = 479 (0x1df), region = 40  ;;  %337 = vmatprep.mubr.f32.mxu0 (!%p212_p10), %v688_v0  ;;  %426 = vmatprep.mubr.f32.mxu1 (!%p212_p10), %v688_v0  ;;  %v347_v3 = vld [vmem:[%s853_s4] sm:$0xff] (!%p212_p10)  ;;  %vm264_vm1 = vcmask (!%p212_p10), 31744   ;;  %s240_s27 = sand.u32 (!%p212_p10), 1, %s670_s19  }
  0x10   : > { %606 = vset.pattern.permute.xlu0 (!%p212_p10), %v689_v2  ;;  %v255_v6 = vld [vmem:[%s850_s1] sm:$0xf] (!%p212_p10)  ;;  %s533_s29 = sshll.u32 (!%p212_p10), %s240_s27, 4  ;;  %s548_s7 = sshll.u32 (!%p212_p10), %s678_s21, 8 }
  0x11   : > { %259 = vperm.xlu0 (!%p212_p10), %606, %v256_v1   ;;  %v346_v14 = vld [vmem:[%s852_s3] sm:$0xff] (!%p212_p10)  ;;  %s242_s8 = scalar_lea.vmem (!%p212_p10), [#allocation2], %s533_s29  ;;  %s802_s12 = scalar_lea.hbm (!%p212_p10), %s854_s5, %s548_s7 }
  0x12   : > { %s690_s14 = smov (!%p212_p10), [#allocation2]  }
  0x15   : > { %350 = vperm.xlu0 (!%p212_p10), %606, %v347_v3  }
  0x16   : > { %s245_s9 = scalar_select %p244_p11, %s678_s21, 1 }
  0x17   : > { %s436_s21 = scalar_lea.sflag [#allocation3], %s240_s27 }
  0x18   : > { %s547_s10 = sshll.u32 %s245_s9, 3  ;;  %s452_s9 = sshll.u32 %s242_s8, 4  ;;  %s804_s9 = int_to_ptr.vmem [resolvable:$true] %s452_s9 }
  0x19   : > { %s251_s15 = scalar_lea.vmem %s849_s0, %s547_s10  ;;  %s608_s13 = scalar_lea.vmem %s804_s9, 256 }
  0x1a   : > { %v254_v4 = vld [vmem:[%s251_s15] sm:$0xff]  ;;  %p609_p12 = scmp.ne.s32.totalorder %s804_s9, %s608_s13  ;;  %s612_s15 = sshll.u32 %s690_s14, 4  ;;  %s613_s15 = int_to_ptr.vmem [resolvable:$false] %s612_s15 }
  0x1b   : > { %v263_v5 = vcombine.high %v254_v4, %v254_v4  ;;  %s614_s16 = scalar_lea.vmem %s613_s15, 512  ;;  %p615_p1 = scmp.lt.s32.totalorder %s804_s9, %s613_s15 }
  0x1c   : > { %p610_p13 = pnand %p609_p12, %p761_p4  ;;  %p616_p2 = scmp.lt.s32.totalorder %s614_s16, %s608_s13 }
  0x1d   : > { %536 = vmatprep.subr.msk.mxu0 %vm268_vm0, %v263_v5 }
  0x1e   : > { %537 = vmatpush1.msk.msra.mxu0 %vm268_vm0, %v254_v4  ;;  %p611_p0 = pneg %p610_p13  ;;  %p617_p3 = por %p616_p2, %p615_p1 }
  0x1f   : > { %538 = vmatmul.mubr.msk.f32.vlgmr.msra.gmra.mrb[0].mxu0 %vm264_vm1, %v255_v6 }
  0x20   : > { %p618_p5 = pnand %p617_p3, %p611_p0 }
  0x90   : > { %v260_v7 = vpop.permute.xlu0 %259 }
  0x94   : > { %v351_v15 = vpop.permute.xlu0 %350 }
  0xf2   : > { %v339_v8 = vpop.f32.mrb[0].mxu0 }
  0xf3   : > { %v340_v9 = vadd.f32 %v339_v8, %v260_v7  ;;  %v341_v10 = vpop.f32.mrb[1].mxu0 }
  0xf4   : > { %v342_v11 = vadd.f32 %v341_v10, %v260_v7 }
  0xf5   : > { %v344_v13 = vmax.f32 %v340_v9, 0.0 }
  0xf6   : > { %v345_v12 = vmax.f32 %v342_v11, 0.0 }
  0xf8   : > { %539 = vmatprep.subr.msk.mxu1 %vm268_vm0, %v345_v12 }
  0xf9   : > { %540 = vmatpush1.msk.msra.mxu1 %vm268_vm0, %v344_v13 }
  0xfa   : > { %541 = vmatmul.mubr.msk.f32.vlgmr.msra.gmra.mrb[0].mxu1 %vm264_vm1, %v346_v14 }
 0x1cd   : > { %v428_v16 = vpop.f32.mrb[0].mxu1 }
 0x1ce   : > { %v429_v17 = vadd.f32 %v428_v16, %v351_v15  ;;  %v430_v18 = vpop.f32.mrb[1].mxu1 }
 0x1cf   : > { %v431_v19 = vadd.f32 %v430_v18, %v351_v15 }
 0x1d0   : > { %433 = vst [vmem:[%s242_s8] sm:$0xff] %v429_v17 }
 0x1d1   : > { %434 = vst [vmem:[%s242_s8 + $0x8] sm:$0xff] %v431_v19 }
 0x1d2   : > { %621 = shalt.err (!%p618_p5)
}
 0x1d3   : > { %s622_s17 = scalar_lea.hbm %s802_s12, 256  ;;  %s626_s27 = scalar_lea.hbm %s854_s5, 512 }
 0x1d4   : > { %p623_p6 = scmp.ne.s32.totalorder %s802_s12, %s622_s17  ;;  %p627_p10 = scmp.lt.u32.totalorder %s802_s12, %s854_s5 }
 0x1d5   : > { %p628_p11 = scmp.lt.u32.totalorder %s626_s27, %s622_s17  ;;  %p630_p13 = scmp.lt.u32.totalorder %s622_s17, %s802_s12 }
 0x1d6   : > { %p624_p7 = pnand %p623_p6, %p761_p4 }
 0x1d7   : > { %p629_p12 = por %p628_p11, %p627_p10 }
 0x1d8   : > { %p625_p9 = pneg %p624_p7 }
 0x1d9   : > { %p631_p0 = por %p630_p13, %p629_p12 }
 0x1db   : > { %p632_p1 = pnand %p631_p0, %p625_p9 }
 0x1dd   : > { %635 = shalt.err (!%p632_p1)
}
 0x1de   : > { %549 = dma.vmem_to_hbm [thread:$0]  (%p761_p4), %s804_s9, 256, %s802_s12, %s436_s21  }
 0x1df PF: > { %p555_p2 = scmp.ge.s32.totalorder %s686_s23, 2  ;;  %s464_s8 = sand.u32 1, %s666_s18  }
 0x1e0   : > { %s465_s10 = scalar_lea.sflag [#allocation3], %s464_s8 }
 0x1e1   : > { %p552_p3 = pnand %p555_p2, %p768_p8 }
 0x1e3   : > { %661 = dma.done.wait (!%p552_p3), %s465_s10, 256  }
 0x1e4   : > { %663 = vsyncadd (!%p552_p3), %s465_s10, 4294967040  ;;  %s18_s23 = sadd.s32 1, %s686_s23   ;;  %s857_s18 = smov %s670_s19 }
 0x1e5   : > { %p15_p5 = scmp.ge.s32.totalorder %s18_s23, 4   ;;  %s858_s19 = smov %s674_s20 }
 0x1e6   : > { %s859_s20 = smov %s774_s6  ;;  %s860_s21 = smov %s682_s22 }
 0x1e7   : > { %s861_s22 = smov %s863_s26  ;;  %17 = sbr.rel (!%p15_p5) target bundleno = 4 (0x4), region = 75 }
 0x1ee   :  { %470 = vsyncpa [#allocation3], 1 }
 0x1ef   :  { %472 = vsyncpa [#allocation3 + $0x1], 1 }

</bundles_post_ra>
